<compile_context>
chip_gen: v7x
topology: tpu7x:2x2x1
jax: 0.10.0
libtpu: 0.0.40
codegen_flags: <defaults>
</compile_context>

<pallas_src>
import functools

import jax
import jax.numpy as jnp
from jax.experimental import pallas as pl
from jax.experimental.pallas import tpu as pltpu


# ----------------------------------------------------------------------------
# Pallas kernel: one (direction, time-chunk) tile of one bidirectional LSTM
# layer.  h/c live in VMEM scratch across time-chunk grid steps; the per-chunk
# recurrence runs as a bounded-unroll fori_loop with one fused (B, 4H) MXU
# matmul per step.
# ----------------------------------------------------------------------------
def _bilstm_dir_kernel(xg_ref, whh_ref, y_ref, hT_ref, cT_ref,
                       h_scr, c_scr, *, unroll):
    """xg_ref : (1, Tc, B, 4H) bf16  x @ W_ih + b_ih + b_hh  (gates i|f|g|o)
       whh_ref: (1, H, 4H)     bf16  recurrent weights
       y_ref  : (1, Tc, B, H)  bf16  hidden states in ORIGINAL time order
       hT_ref : (1, B, H)      f32   final hidden state
       cT_ref : (1, B, H)      f32   final cell state
       h_scr  : (B, H)         bf16  carried hidden state (across chunks)
       c_scr  : (B, H)         f32   carried cell state   (across chunks)
    """
    d = pl.program_id(0)          # 0 = forward, 1 = backward
    tc = pl.program_id(1)         # time-chunk index (chunk reversal in index_map)
    Tc = xg_ref.shape[1]
    H = y_ref.shape[3]

    @pl.when(tc == 0)
    def _():
        h_scr[...] = jnp.zeros_like(h_scr)
        c_scr[...] = jnp.zeros_like(c_scr)

    whh = whh_ref[0]              # (H, 4H) bf16, loaded once per chunk

    def step(t, carry):
        h_prev, c_prev = carry                           # bf16, f32
        # Within-chunk time reversal for the backward direction.
        idx = jnp.where(d == 0, t, Tc - 1 - t)
        # Single fused MXU push per step; input projection was precomputed.
        gates = xg_ref[0, idx].astype(jnp.float32) + jnp.dot(
            h_prev, whh, preferred_element_type=jnp.float32)   # (B, 4H) f32
        i_g = jax.nn.sigmoid(gates[:, 0 * H:1 * H])
        f_g = jax.nn.sigmoid(gates[:, 1 * H:2 * H])
        g_g = jnp.tanh(gates[:, 2 * H:3 * H])
        o_g = jax.nn.sigmoid(gates[:, 3 * H:4 * H])
        c_new = f_g * c_prev + i_g * g_g                 # f32 cell state
        h_new = (o_g * jnp.tanh(c_new)).astype(jnp.bfloat16)
        y_ref[0, idx] = h_new.astype(y_ref.dtype)
        return h_new, c_new

    h0 = h_scr[...]
    c0 = c_scr[...]
    hT, cT = jax.lax.fori_loop(0, Tc, step, (h0, c0), unroll=unroll)

    # Persist the carry for the next chunk; final-state outputs are tiny and
    # resident, so writing them every chunk is safe and cheap.
    h_scr[...] = hT
    c_scr[...] = cT
    hT_ref[0] = hT.astype(hT_ref.dtype)
    cT_ref[0] = cT.astype(cT_ref.dtype)


def _pick_chunk(T, step_bytes, budget_bytes=2 * 1024 * 1024):
    """Largest divisor of T whose bf16 xg chunk stays under ~2 MiB."""
    max_tc = max(1, budget_bytes // max(step_bytes, 1))
    tc = 1
    for cand in range(1, T + 1):
        if T % cand == 0 and cand <= max_tc:
            tc = cand
    return tc


def _pick_unroll(tc):
    for u in (8, 4, 2, 1):
        if tc % u == 0:
            return u
    return 1


def bilstm_layer(xg, whh):
    """Run both directions of one LSTM layer.

    xg : (2, T, B, 4H) bf16  precomputed input projections (+ folded biases)
    whh: (2, H, 4H)    bf16  recurrent weights
    returns y (2, T, B, H) bf16 [fwd, bwd], h_T (2, B, H) f32, c_T (2, B, H) f32
    """
    _, T, B, G = xg.shape
    H = G // 4

    step_bytes = B * G * xg.dtype.itemsize
    Tc = _pick_chunk(T, step_bytes)
    nTc = T // Tc
    unroll = _pick_unroll(Tc)

    kernel = functools.partial(_bilstm_dir_kernel, unroll=unroll)

    # VMEM budget: double-buffered pipeline blocks + scratch + compiler margin,
    # capped by the actual chip's VMEM capacity.
    xg_blk = Tc * B * G * 2          # bf16
    y_blk = Tc * B * H * 2           # bf16
    whh_blk = H * G * 2              # bf16
    state_blk = B * H * 4            # f32 hT / cT
    needed = (2 * (xg_blk + y_blk + whh_blk + 2 * state_blk)
              + B * H * (2 + 4))     # scratch h (bf16) + c (f32)
    try:
        cap = int(0.75 * pltpu.get_tpu_info().vmem_capacity_bytes)
    except Exception:                # pragma: no cover - conservative fallback
        cap = 48 * 1024 * 1024
    vmem_limit = int(min(max(needed + (8 << 20), 16 << 20), cap))

    # Backward direction walks time chunks in reverse order: pure index math.
    def chunk_idx(d, tc_):
        return (d, (1 - d) * tc_ + d * (nTc - 1 - tc_), 0, 0)

    return pl.pallas_call(
        kernel,
        out_shape=(jax.ShapeDtypeStruct((2, T, B, H), jnp.bfloat16),
                   jax.ShapeDtypeStruct((2, B, H), jnp.float32),
                   jax.ShapeDtypeStruct((2, B, H), jnp.float32)),
        grid_spec=pltpu.PrefetchScalarGridSpec(
            num_scalar_prefetch=0,
            grid=(2, nTc),                               # (direction, time chunk)
            in_specs=[
                pl.BlockSpec((1, Tc, B, G), chunk_idx),
                pl.BlockSpec((1, H, G), lambda d, tc_: (d, 0, 0)),
            ],
            out_specs=(
                pl.BlockSpec((1, Tc, B, H), chunk_idx),
                pl.BlockSpec((1, B, H), lambda d, tc_: (d, 0, 0)),
                pl.BlockSpec((1, B, H), lambda d, tc_: (d, 0, 0)),
            ),
            scratch_shapes=[
                pltpu.VMEM((B, H), jnp.bfloat16),        # h carry
                pltpu.VMEM((B, H), jnp.float32),         # c carry
            ],
        ),
        compiler_params=pltpu.CompilerParams(
            dimension_semantics=("parallel", "arbitrary"),
            vmem_limit_bytes=vmem_limit,
        ),
    )(xg, whh)


# ----------------------------------------------------------------------------
# Encoder forward: embedding lookup (XLA glue) + stacked bidirectional LSTM.
# ----------------------------------------------------------------------------
def encoder_forward(params, data):
    """data: (T, B) int32 token ids.

    Returns (output, (h_n, c_n)) exactly like PyTorch's
    `self.rnn(self.embed_dropout(self.embed(data)))`:
      output : (T, B, 2*H) f32
      h_n    : (2*n_layers, B, H) f32  order [l0_fwd, l0_bwd, l1_fwd, ...]
      c_n    : (2*n_layers, B, H) f32
    """
    emb = jnp.take(params["embed"], data, axis=0)        # (T, B, E) f32
    # TODO(synk): embed_dropout is identity here (p=0 / eval); a training-mode
    # dropout mask would use pltpu.prng_seed + pltpu.stateful_bernoulli.

    y_pair = None
    h_list, c_list = [], []
    for li, layer in enumerate(params["lstm"]):
        wih, whh, b = layer["wih"], layer["whh"], layer["b"]
        G = wih.shape[-1]
        H = G // 4
        if li == 0:
            # One big, fully parallel input projection for all T and both dirs.
            xg = jnp.einsum("tbe,deg->dtbg", emb, wih,
                            preferred_element_type=jnp.float32)
        else:
            # Previous layer output kept stacked (2, T, B, H) bf16; contracting
            # over (source-direction, H) == multiplying the concatenated
            # (2H, 4H) W_ih -> no (T, B, 2H) concat copy materialised.
            wih_r = wih.reshape(2, 2, H, G)
            xg = jnp.einsum("stbh,dshg->dtbg", y_pair, wih_r,
                            preferred_element_type=jnp.float32)
        xg = (xg + b[:, None, None, :]).astype(jnp.bfloat16)   # bias folded once

        y_pair, hT, cT = bilstm_layer(xg, whh)
        h_list.append(hT)
        c_list.append(cT)

    output = jnp.concatenate([y_pair[0], y_pair[1]],
                             axis=-1).astype(jnp.float32)      # (T, B, 2H)
    h_n = jnp.concatenate(h_list, axis=0)                      # (2L, B, H)
    c_n = jnp.concatenate(c_list, axis=0)
    return output, (h_n, c_n)


# ----------------------------------------------------------------------------
# Pure-JAX reference (f32, lax.scan) for a tolerance check.
# ----------------------------------------------------------------------------
def encoder_reference(params, data):
    emb = jnp.take(params["embed"], data, axis=0)
    T, B = data.shape
    x = emb
    h_list, c_list = [], []
    for layer in params["lstm"]:
        wih = layer["wih"].astype(jnp.float32)
        whh = layer["whh"].astype(jnp.float32)
        b = layer["b"].astype(jnp.float32)
        H = whh.shape[1]
        outs = []
        for d in range(2):
            def step(carry, x_t, d=d):
                h, c = carry
                g = x_t @ wih[d] + h @ whh[d] + b[d]
                i = jax.nn.sigmoid(g[:, 0 * H:1 * H])
                f = jax.nn.sigmoid(g[:, 1 * H:2 * H])
                gg = jnp.tanh(g[:, 2 * H:3 * H])
                o = jax.nn.sigmoid(g[:, 3 * H:4 * H])
                c = f * c + i * gg
                h = o * jnp.tanh(c)
                return (h, c), h
            xs = x if d == 0 else x[::-1]
            init = (jnp.zeros((B, H), jnp.float32), jnp.zeros((B, H), jnp.float32))
            (hT, cT), ys = jax.lax.scan(step, init, xs)
            if d == 1:
                ys = ys[::-1]
            outs.append(ys)
            h_list.append(hT)
            c_list.append(cT)
        x = jnp.concatenate(outs, axis=-1)
    return x, (jnp.stack(h_list), jnp.stack(c_list))


# ----------------------------------------------------------------------------
# Deterministic synthetic parameter init (shapes of nn.Embedding + nn.LSTM).
# Weights stored gate-fused: W_ih (2, in, 4H) f32, W_hh (2, H, 4H) bf16,
# b = b_ih + b_hh (2, 4H) f32.
# ----------------------------------------------------------------------------
def init_params(key, vocab_size, pad_idx, n_embed, n_hidden, n_layers):
    keys = jax.random.split(key, 1 + 4 * 2 * n_layers)
    k_iter = iter(keys)

    embed = jax.random.normal(next(k_iter), (vocab_size, n_embed),
                              dtype=jnp.float32) * 0.1
    embed = embed.at[pad_idx].set(0.0)       # padding_idx row is zero

    bound = 1.0 / (float(n_hidden) ** 0.5)

    def direction(in_size):
        wih = jax.random.uniform(next(k_iter), (in_size, 4 * n_hidden),
                                 jnp.float32, -bound, bound)
        whh = jax.random.uniform(next(k_iter), (n_hidden, 4 * n_hidden),
                                 jnp.float32, -bound, bound)
        b_ih = jax.random.uniform(next(k_iter), (4 * n_hidden,),
                                  jnp.float32, -bound, bound)
        b_hh = jax.random.uniform(next(k_iter), (4 * n_hidden,),
                                  jnp.float32, -bound, bound)
        return wih, whh, b_ih + b_hh          # fold the two biases together

    lstm = []
    for layer in range(n_layers):
        in_size = n_embed if layer == 0 else 2 * n_hidden
        fwd = direction(in_size)
        bwd = direction(in_size)
        lstm.append({
            "wih": jnp.stack([fwd[0], bwd[0]], axis=0),                    # f32
            "whh": jnp.stack([fwd[1], bwd[1]], axis=0).astype(jnp.bfloat16),
            "b":   jnp.stack([fwd[2], bwd[2]], axis=0),                    # f32
        })

    return {"embed": embed, "lstm": lstm}


if __name__ == "__main__":
    # Small synthetic configuration.
    VOCAB_SIZE = 20
    PAD_IDX = 0
    N_EMBED = 16
    N_HIDDEN = 32       # 4H = 128 -> lane-dense fused gate block
    N_LAYERS = 2
    T, B = 8, 2

    root = jax.random.PRNGKey(0)
    k_param, k_data = jax.random.split(root)

    params = init_params(k_param, VOCAB_SIZE, PAD_IDX,
                         N_EMBED, N_HIDDEN, N_LAYERS)
    data = jax.random.randint(k_data, (T, B), 0, VOCAB_SIZE, dtype=jnp.int32)

    fwd = jax.jit(functools.partial(encoder_forward, params))
    output, (h_n, c_n) = fwd(data)
    jax.block_until_ready((output, h_n, c_n))

    assert output.shape == (T, B, 2 * N_HIDDEN)
    assert h_n.shape == (2 * N_LAYERS, B, N_HIDDEN)
    assert c_n.shape == (2 * N_LAYERS, B, N_HIDDEN)
    assert bool(jnp.all(jnp.isfinite(output)))

    # Loose-tolerance check against an f32 lax.scan reference (bf16 activations
    # in the kernel path introduce ~1e-3-level differences).
    ref_out, (ref_h, ref_c) = jax.jit(
        functools.partial(encoder_reference, params))(data)
    assert float(jnp.max(jnp.abs(output - ref_out))) < 3e-2
    assert float(jnp.max(jnp.abs(h_n - ref_h))) < 3e-2
    assert float(jnp.max(jnp.abs(c_n - ref_c))) < 3e-2

    print("KERNEL_OK")
</pallas_src>

<mosaic_0001>
module attributes {stable_mosaic.version = 11 : i64} {
  func.func @_bilstm_dir_kernel(%arg0: i32, %arg1: i32, %arg2: memref<1x8x2x128xbf16, #tpu.memory_space<vmem>>, %arg3: memref<1x32x128xbf16, #tpu.memory_space<vmem>>, %arg4: memref<1x8x2x32xbf16, #tpu.memory_space<vmem>>, %arg5: memref<1x2x32xf32, #tpu.memory_space<vmem>>, %arg6: memref<1x2x32xf32, #tpu.memory_space<vmem>>, %arg7: memref<2x32xbf16, #tpu.memory_space<vmem>>, %arg8: memref<2x32xf32, #tpu.memory_space<vmem>>) attributes {dimension_semantics = [#tpu.dimension_semantics<parallel>, #tpu.dimension_semantics<arbitrary>], iteration_bounds = array<i64: 2, 1>, scalar_prefetch = 0 : i64, scratch_operands = 2 : i64, tpu.core_type = #tpu.core_type<tc>, window_params = [{transform_indices = @transform_0, window_bounds = array<i64: 1, 8, 2, 128>}, {transform_indices = @transform_1, window_bounds = array<i64: 1, 32, 128>}, {transform_indices = @transform_2, window_bounds = array<i64: 1, 8, 2, 32>}, {transform_indices = @transform_3, window_bounds = array<i64: 1, 2, 32>}, {transform_indices = @transform_4, window_bounds = array<i64: 1, 2, 32>}]} {
    %c0_i32 = arith.constant 0 : i32
    %0 = arith.cmpi eq, %arg1, %c0_i32 : i32
    %1 = arith.extui %0 : i1 to i32
    %c0_i32_0 = arith.constant 0 : i32
    %2 = arith.cmpi ne, %1, %c0_i32_0 : i32
    scf.if %2 {
      %cst_113 = arith.constant 0.000000e+00 : bf16
      %328 = vector.broadcast %cst_113 : bf16 to vector<2x32xbf16>
      %c0_114 = arith.constant 0 : index
      %c0_115 = arith.constant 0 : index
      %329 = vector.load %arg7[%c0_114, %c0_115] : memref<2x32xbf16, #tpu.memory_space<vmem>>, vector<2x32xbf16>
      tpu.vector_store %arg7[%c0_114, %c0_115], %328 {strides = array<i32>} : memref<2x32xbf16, #tpu.memory_space<vmem>>, vector<2x32xbf16>,
      %cst_116 = arith.constant 0.000000e+00 : f32
      %330 = vector.broadcast %cst_116 : f32 to vector<2x32xf32>
      %c0_117 = arith.constant 0 : index
      %c0_118 = arith.constant 0 : index
      %331 = vector.load %arg8[%c0_117, %c0_118] : memref<2x32xf32, #tpu.memory_space<vmem>>, vector<2x32xf32>
      tpu.vector_store %arg8[%c0_117, %c0_118], %330 {strides = array<i32>} : memref<2x32xf32, #tpu.memory_space<vmem>>, vector<2x32xf32>,
    } else {
    }
    %c0 = arith.constant 0 : index
    %c0_1 = arith.constant 0 : index
    %c0_2 = arith.constant 0 : index
    %3 = vector.load %arg3[%c0, %c0_1, %c0_2] : memref<1x32x128xbf16, #tpu.memory_space<vmem>>, vector<1x32x128xbf16>
    %4 = vector.shape_cast %3 : vector<1x32x128xbf16> to vector<32x128xbf16>
    %c0_3 = arith.constant 0 : index
    %c0_4 = arith.constant 0 : index
    %5 = vector.load %arg7[%c0_3, %c0_4] : memref<2x32xbf16, #tpu.memory_space<vmem>>, vector<2x32xbf16>
    %c0_5 = arith.constant 0 : index
    %c0_6 = arith.constant 0 : index
    %6 = vector.load %arg8[%c0_5, %c0_6] : memref<2x32xf32, #tpu.memory_space<vmem>>, vector<2x32xf32>
    %c0_i32_7 = arith.constant 0 : i32
    %c0_i32_8 = arith.constant 0 : i32
    %7 = arith.cmpi eq, %arg0, %c0_i32_8 : i32
    %c7_i32 = arith.constant 7 : i32
    %8 = arith.subi %c7_i32, %c0_i32_7 : i32
    %9 = arith.select %7, %c0_i32_7, %8 : i32
    %c0_9 = arith.constant 0 : index
    %10 = arith.index_cast %9 : i32 to index
    %c0_10 = arith.constant 0 : index
    %c0_11 = arith.constant 0 : index
    %11 = vector.load %arg2[%c0_9, %10, %c0_10, %c0_11] : memref<1x8x2x128xbf16, #tpu.memory_space<vmem>>, vector<1x1x2x128xbf16>
    %12 = vector.shape_cast %11 : vector<1x1x2x128xbf16> to vector<2x128xbf16>
    %13 = arith.extf %12 : vector<2x128xbf16> to vector<2x128xf32>
    %cst = arith.constant dense<0.000000e+00> : vector<2x128xf32>
    %14 = tpu.matmul %5, %4, %cst {dimension_numbers = #tpu.dot_dimension_numbers<[1], [0], [0], [1], [0, 0, 1, 1], [], []>} : vector<2x32xbf16>, vector<32x128xbf16>, vector<2x128xf32> -> vector<2x128xf32>
    %15 = arith.addf %13, %14 : vector<2x128xf32>
    %16 = vector.extract_strided_slice %15 {offsets = [0, 0], sizes = [2, 32], strides = [1, 1]} : vector<2x128xf32> to vector<2x32xf32>
    %17 = arith.negf %16 : vector<2x32xf32>
    %18 = math.exp %17 : vector<2x32xf32>
    %cst_12 = arith.constant 1.000000e+00 : f32
    %19 = vector.broadcast %cst_12 : f32 to vector<2x32xf32>
    %20 = arith.addf %19, %18 : vector<2x32xf32>
    %21 = arith.divf %19, %20 : vector<2x32xf32>
    %22 = vector.extract_strided_slice %15 {offsets = [0, 32], sizes = [2, 32], strides = [1, 1]} : vector<2x128xf32> to vector<2x32xf32>
    %23 = arith.negf %22 : vector<2x32xf32>
    %24 = math.exp %23 : vector<2x32xf32>
    %cst_13 = arith.constant 1.000000e+00 : f32
    %25 = vector.broadcast %cst_13 : f32 to vector<2x32xf32>
    %26 = arith.addf %25, %24 : vector<2x32xf32>
    %27 = arith.divf %25, %26 : vector<2x32xf32>
    %28 = vector.extract_strided_slice %15 {offsets = [0, 64], sizes = [2, 32], strides = [1, 1]} : vector<2x128xf32> to vector<2x32xf32>
    %29 = math.tanh %28 : vector<2x32xf32>
    %30 = vector.extract_strided_slice %15 {offsets = [0, 96], sizes = [2, 32], strides = [1, 1]} : vector<2x128xf32> to vector<2x32xf32>
    %31 = arith.negf %30 : vector<2x32xf32>
    %32 = math.exp %31 : vector<2x32xf32>
    %cst_14 = arith.constant 1.000000e+00 : f32
    %33 = vector.broadcast %cst_14 : f32 to vector<2x32xf32>
    %34 = arith.addf %33, %32 : vector<2x32xf32>
    %35 = arith.divf %33, %34 : vector<2x32xf32>
    %36 = arith.mulf %27, %6 : vector<2x32xf32>
    %37 = arith.mulf %21, %29 : vector<2x32xf32>
    %38 = arith.addf %36, %37 : vector<2x32xf32>
    %39 = math.tanh %38 : vector<2x32xf32>
    %40 = arith.mulf %35, %39 : vector<2x32xf32>
    %41 = arith.truncf %40 : vector<2x32xf32> to vector<2x32xbf16>
    %c0_15 = arith.constant 0 : index
    %42 = arith.index_cast %9 : i32 to index
    %c0_16 = arith.constant 0 : index
    %c0_17 = arith.constant 0 : index
    %43 = vector.load %arg4[%c0_15, %42, %c0_16, %c0_17] : memref<1x8x2x32xbf16, #tpu.memory_space<vmem>>, vector<1x1x2x32xbf16>
    %44 = vector.shape_cast %43 : vector<1x1x2x32xbf16> to vector<2x32xbf16>
    %45 = vector.shape_cast %41 : vector<2x32xbf16> to vector<1x1x2x32xbf16>
    tpu.vector_store %arg4[%c0_15, %42, %c0_16, %c0_17], %45 {strides = array<i32>} : memref<1x8x2x32xbf16, #tpu.memory_space<vmem>>, vector<1x1x2x32xbf16>,
    %c1_i32 = arith.constant 1 : i32
    %c0_i32_18 = arith.constant 0 : i32
    %46 = arith.cmpi eq, %arg0, %c0_i32_18 : i32
    %c7_i32_19 = arith.constant 7 : i32
    %47 = arith.subi %c7_i32_19, %c1_i32 : i32
    %48 = arith.select %46, %c1_i32, %47 : i32
    %c0_20 = arith.constant 0 : index
    %49 = arith.index_cast %48 : i32 to index
    %c0_21 = arith.constant 0 : index
    %c0_22 = arith.constant 0 : index
    %50 = vector.load %arg2[%c0_20, %49, %c0_21, %c0_22] : memref<1x8x2x128xbf16, #tpu.memory_space<vmem>>, vector<1x1x2x128xbf16>
    %51 = vector.shape_cast %50 : vector<1x1x2x128xbf16> to vector<2x128xbf16>
    %52 = arith.extf %51 : vector<2x128xbf16> to vector<2x128xf32>
    %cst_23 = arith.constant dense<0.000000e+00> : vector<2x128xf32>
    %53 = tpu.matmul %41, %4, %cst_23 {dimension_numbers = #tpu.dot_dimension_numbers<[1], [0], [0], [1], [0, 0, 1, 1], [], []>} : vector<2x32xbf16>, vector<32x128xbf16>, vector<2x128xf32> -> vector<2x128xf32>
    %54 = arith.addf %52, %53 : vector<2x128xf32>
    %55 = vector.extract_strided_slice %54 {offsets = [0, 0], sizes = [2, 32], strides = [1, 1]} : vector<2x128xf32> to vector<2x32xf32>
    %56 = arith.negf %55 : vector<2x32xf32>
    %57 = math.exp %56 : vector<2x32xf32>
    %cst_24 = arith.constant 1.000000e+00 : f32
    %58 = vector.broadcast %cst_24 : f32 to vector<2x32xf32>
    %59 = arith.addf %58, %57 : vector<2x32xf32>
    %60 = arith.divf %58, %59 : vector<2x32xf32>
    %61 = vector.extract_strided_slice %54 {offsets = [0, 32], sizes = [2, 32], strides = [1, 1]} : vector<2x128xf32> to vector<2x32xf32>
    %62 = arith.negf %61 : vector<2x32xf32>
    %63 = math.exp %62 : vector<2x32xf32>
    %cst_25 = arith.constant 1.000000e+00 : f32
    %64 = vector.broadcast %cst_25 : f32 to vector<2x32xf32>
    %65 = arith.addf %64, %63 : vector<2x32xf32>
    %66 = arith.divf %64, %65 : vector<2x32xf32>
    %67 = vector.extract_strided_slice %54 {offsets = [0, 64], sizes = [2, 32], strides = [1, 1]} : vector<2x128xf32> to vector<2x32xf32>
    %68 = math.tanh %67 : vector<2x32xf32>
    %69 = vector.extract_strided_slice %54 {offsets = [0, 96], sizes = [2, 32], strides = [1, 1]} : vector<2x128xf32> to vector<2x32xf32>
    %70 = arith.negf %69 : vector<2x32xf32>
    %71 = math.exp %70 : vector<2x32xf32>
    %cst_26 = arith.constant 1.000000e+00 : f32
    %72 = vector.broadcast %cst_26 : f32 to vector<2x32xf32>
    %73 = arith.addf %72, %71 : vector<2x32xf32>
    %74 = arith.divf %72, %73 : vector<2x32xf32>
    %75 = arith.mulf %66, %38 : vector<2x32xf32>
    %76 = arith.mulf %60, %68 : vector<2x32xf32>
    %77 = arith.addf %75, %76 : vector<2x32xf32>
    %78 = math.tanh %77 : vector<2x32xf32>
    %79 = arith.mulf %74, %78 : vector<2x32xf32>
    %80 = arith.truncf %79 : vector<2x32xf32> to vector<2x32xbf16>
    %c0_27 = arith.constant 0 : index
    %81 = arith.index_cast %48 : i32 to index
    %c0_28 = arith.constant 0 : index
    %c0_29 = arith.constant 0 : index
    %82 = vector.load %arg4[%c0_27, %81, %c0_28, %c0_29] : memref<1x8x2x32xbf16, #tpu.memory_space<vmem>>, vector<1x1x2x32xbf16>
    %83 = vector.shape_cast %82 : vector<1x1x2x32xbf16> to vector<2x32xbf16>
    %84 = vector.shape_cast %80 : vector<2x32xbf16> to vector<1x1x2x32xbf16>
    tpu.vector_store %arg4[%c0_27, %81, %c0_28, %c0_29], %84 {strides = array<i32>} : memref<1x8x2x32xbf16, #tpu.memory_space<vmem>>, vector<1x1x2x32xbf16>,
    %c2_i32 = arith.constant 2 : i32
    %c0_i32_30 = arith.constant 0 : i32
    %85 = arith.cmpi eq, %arg0, %c0_i32_30 : i32
    %c7_i32_31 = arith.constant 7 : i32
    %86 = arith.subi %c7_i32_31, %c2_i32 : i32
    %87 = arith.select %85, %c2_i32, %86 : i32
    %c0_32 = arith.constant 0 : index
    %88 = arith.index_cast %87 : i32 to index
    %c0_33 = arith.constant 0 : index
    %c0_34 = arith.constant 0 : index
    %89 = vector.load %arg2[%c0_32, %88, %c0_33, %c0_34] : memref<1x8x2x128xbf16, #tpu.memory_space<vmem>>, vector<1x1x2x128xbf16>
    %90 = vector.shape_cast %89 : vector<1x1x2x128xbf16> to vector<2x128xbf16>
    %91 = arith.extf %90 : vector<2x128xbf16> to vector<2x128xf32>
    %cst_35 = arith.constant dense<0.000000e+00> : vector<2x128xf32>
    %92 = tpu.matmul %80, %4, %cst_35 {dimension_numbers = #tpu.dot_dimension_numbers<[1], [0], [0], [1], [0, 0, 1, 1], [], []>} : vector<2x32xbf16>, vector<32x128xbf16>, vector<2x128xf32> -> vector<2x128xf32>
    %93 = arith.addf %91, %92 : vector<2x128xf32>
    %94 = vector.extract_strided_slice %93 {offsets = [0, 0], sizes = [2, 32], strides = [1, 1]} : vector<2x128xf32> to vector<2x32xf32>
    %95 = arith.negf %94 : vector<2x32xf32>
    %96 = math.exp %95 : vector<2x32xf32>
    %cst_36 = arith.constant 1.000000e+00 : f32
    %97 = vector.broadcast %cst_36 : f32 to vector<2x32xf32>
    %98 = arith.addf %97, %96 : vector<2x32xf32>
    %99 = arith.divf %97, %98 : vector<2x32xf32>
    %100 = vector.extract_strided_slice %93 {offsets = [0, 32], sizes = [2, 32], strides = [1, 1]} : vector<2x128xf32> to vector<2x32xf32>
    %101 = arith.negf %100 : vector<2x32xf32>
    %102 = math.exp %101 : vector<2x32xf32>
    %cst_37 = arith.constant 1.000000e+00 : f32
    %103 = vector.broadcast %cst_37 : f32 to vector<2x32xf32>
    %104 = arith.addf %103, %102 : vector<2x32xf32>
    %105 = arith.divf %103, %104 : vector<2x32xf32>
    %106 = vector.extract_strided_slice %93 {offsets = [0, 64], sizes = [2, 32], strides = [1, 1]} : vector<2x128xf32> to vector<2x32xf32>
    %107 = math.tanh %106 : vector<2x32xf32>
    %108 = vector.extract_strided_slice %93 {offsets = [0, 96], sizes = [2, 32], strides = [1, 1]} : vector<2x128xf32> to vector<2x32xf32>
    %109 = arith.negf %108 : vector<2x32xf32>
    %110 = math.exp %109 : vector<2x32xf32>
    %cst_38 = arith.constant 1.000000e+00 : f32
    %111 = vector.broadcast %cst_38 : f32 to vector<2x32xf32>
    %112 = arith.addf %111, %110 : vector<2x32xf32>
    %113 = arith.divf %111, %112 : vector<2x32xf32>
    %114 = arith.mulf %105, %77 : vector<2x32xf32>
    %115 = arith.mulf %99, %107 : vector<2x32xf32>
    %116 = arith.addf %114, %115 : vector<2x32xf32>
    %117 = math.tanh %116 : vector<2x32xf32>
    %118 = arith.mulf %113, %117 : vector<2x32xf32>
    %119 = arith.truncf %118 : vector<2x32xf32> to vector<2x32xbf16>
    %c0_39 = arith.constant 0 : index
    %120 = arith.index_cast %87 : i32 to index
    %c0_40 = arith.constant 0 : index
    %c0_41 = arith.constant 0 : index
    %121 = vector.load %arg4[%c0_39, %120, %c0_40, %c0_41] : memref<1x8x2x32xbf16, #tpu.memory_space<vmem>>, vector<1x1x2x32xbf16>
    %122 = vector.shape_cast %121 : vector<1x1x2x32xbf16> to vector<2x32xbf16>
    %123 = vector.shape_cast %119 : vector<2x32xbf16> to vector<1x1x2x32xbf16>
    tpu.vector_store %arg4[%c0_39, %120, %c0_40, %c0_41], %123 {strides = array<i32>} : memref<1x8x2x32xbf16, #tpu.memory_space<vmem>>, vector<1x1x2x32xbf16>,
    %c3_i32 = arith.constant 3 : i32
    %c0_i32_42 = arith.constant 0 : i32
    %124 = arith.cmpi eq, %arg0, %c0_i32_42 : i32
    %c7_i32_43 = arith.constant 7 : i32
    %125 = arith.subi %c7_i32_43, %c3_i32 : i32
    %126 = arith.select %124, %c3_i32, %125 : i32
    %c0_44 = arith.constant 0 : index
    %127 = arith.index_cast %126 : i32 to index
    %c0_45 = arith.constant 0 : index
    %c0_46 = arith.constant 0 : index
    %128 = vector.load %arg2[%c0_44, %127, %c0_45, %c0_46] : memref<1x8x2x128xbf16, #tpu.memory_space<vmem>>, vector<1x1x2x128xbf16>
    %129 = vector.shape_cast %128 : vector<1x1x2x128xbf16> to vector<2x128xbf16>
    %130 = arith.extf %129 : vector<2x128xbf16> to vector<2x128xf32>
    %cst_47 = arith.constant dense<0.000000e+00> : vector<2x128xf32>
    %131 = tpu.matmul %119, %4, %cst_47 {dimension_numbers = #tpu.dot_dimension_numbers<[1], [0], [0], [1], [0, 0, 1, 1], [], []>} : vector<2x32xbf16>, vector<32x128xbf16>, vector<2x128xf32> -> vector<2x128xf32>
    %132 = arith.addf %130, %131 : vector<2x128xf32>
    %133 = vector.extract_strided_slice %132 {offsets = [0, 0], sizes = [2, 32], strides = [1, 1]} : vector<2x128xf32> to vector<2x32xf32>
    %134 = arith.negf %133 : vector<2x32xf32>
    %135 = math.exp %134 : vector<2x32xf32>
    %cst_48 = arith.constant 1.000000e+00 : f32
    %136 = vector.broadcast %cst_48 : f32 to vector<2x32xf32>
    %137 = arith.addf %136, %135 : vector<2x32xf32>
    %138 = arith.divf %136, %137 : vector<2x32xf32>
    %139 = vector.extract_strided_slice %132 {offsets = [0, 32], sizes = [2, 32], strides = [1, 1]} : vector<2x128xf32> to vector<2x32xf32>
    %140 = arith.negf %139 : vector<2x32xf32>
    %141 = math.exp %140 : vector<2x32xf32>
    %cst_49 = arith.constant 1.000000e+00 : f32
    %142 = vector.broadcast %cst_49 : f32 to vector<2x32xf32>
    %143 = arith.addf %142, %141 : vector<2x32xf32>
    %144 = arith.divf %142, %143 : vector<2x32xf32>
    %145 = vector.extract_strided_slice %132 {offsets = [0, 64], sizes = [2, 32], strides = [1, 1]} : vector<2x128xf32> to vector<2x32xf32>
    %146 = math.tanh %145 : vector<2x32xf32>
    %147 = vector.extract_strided_slice %132 {offsets = [0, 96], sizes = [2, 32], strides = [1, 1]} : vector<2x128xf32> to vector<2x32xf32>
    %148 = arith.negf %147 : vector<2x32xf32>
    %149 = math.exp %148 : vector<2x32xf32>
    %cst_50 = arith.constant 1.000000e+00 : f32
    %150 = vector.broadcast %cst_50 : f32 to vector<2x32xf32>
    %151 = arith.addf %150, %149 : vector<2x32xf32>
    %152 = arith.divf %150, %151 : vector<2x32xf32>
    %153 = arith.mulf %144, %116 : vector<2x32xf32>
    %154 = arith.mulf %138, %146 : vector<2x32xf32>
    %155 = arith.addf %153, %154 : vector<2x32xf32>
    %156 = math.tanh %155 : vector<2x32xf32>
    %157 = arith.mulf %152, %156 : vector<2x32xf32>
    %158 = arith.truncf %157 : vector<2x32xf32> to vector<2x32xbf16>
    %c0_51 = arith.constant 0 : index
    %159 = arith.index_cast %126 : i32 to index
    %c0_52 = arith.constant 0 : index
    %c0_53 = arith.constant 0 : index
    %160 = vector.load %arg4[%c0_51, %159, %c0_52, %c0_53] : memref<1x8x2x32xbf16, #tpu.memory_space<vmem>>, vector<1x1x2x32xbf16>
    %161 = vector.shape_cast %160 : vector<1x1x2x32xbf16> to vector<2x32xbf16>
    %162 = vector.shape_cast %158 : vector<2x32xbf16> to vector<1x1x2x32xbf16>
    tpu.vector_store %arg4[%c0_51, %159, %c0_52, %c0_53], %162 {strides = array<i32>} : memref<1x8x2x32xbf16, #tpu.memory_space<vmem>>, vector<1x1x2x32xbf16>,
    %c4_i32 = arith.constant 4 : i32
    %c0_i32_54 = arith.constant 0 : i32
    %163 = arith.cmpi eq, %arg0, %c0_i32_54 : i32
    %c7_i32_55 = arith.constant 7 : i32
    %164 = arith.subi %c7_i32_55, %c4_i32 : i32
    %165 = arith.select %163, %c4_i32, %164 : i32
    %c0_56 = arith.constant 0 : index
    %166 = arith.index_cast %165 : i32 to index
    %c0_57 = arith.constant 0 : index
    %c0_58 = arith.constant 0 : index
    %167 = vector.load %arg2[%c0_56, %166, %c0_57, %c0_58] : memref<1x8x2x128xbf16, #tpu.memory_space<vmem>>, vector<1x1x2x128xbf16>
    %168 = vector.shape_cast %167 : vector<1x1x2x128xbf16> to vector<2x128xbf16>
    %169 = arith.extf %168 : vector<2x128xbf16> to vector<2x128xf32>
    %cst_59 = arith.constant dense<0.000000e+00> : vector<2x128xf32>
    %170 = tpu.matmul %158, %4, %cst_59 {dimension_numbers = #tpu.dot_dimension_numbers<[1], [0], [0], [1], [0, 0, 1, 1], [], []>} : vector<2x32xbf16>, vector<32x128xbf16>, vector<2x128xf32> -> vector<2x128xf32>
    %171 = arith.addf %169, %170 : vector<2x128xf32>
    %172 = vector.extract_strided_slice %171 {offsets = [0, 0], sizes = [2, 32], strides = [1, 1]} : vector<2x128xf32> to vector<2x32xf32>
    %173 = arith.negf %172 : vector<2x32xf32>
    %174 = math.exp %173 : vector<2x32xf32>
    %cst_60 = arith.constant 1.000000e+00 : f32
    %175 = vector.broadcast %cst_60 : f32 to vector<2x32xf32>
    %176 = arith.addf %175, %174 : vector<2x32xf32>
    %177 = arith.divf %175, %176 : vector<2x32xf32>
    %178 = vector.extract_strided_slice %171 {offsets = [0, 32], sizes = [2, 32], strides = [1, 1]} : vector<2x128xf32> to vector<2x32xf32>
    %179 = arith.negf %178 : vector<2x32xf32>
    %180 = math.exp %179 : vector<2x32xf32>
    %cst_61 = arith.constant 1.000000e+00 : f32
    %181 = vector.broadcast %cst_61 : f32 to vector<2x32xf32>
    %182 = arith.addf %181, %180 : vector<2x32xf32>
    %183 = arith.divf %181, %182 : vector<2x32xf32>
    %184 = vector.extract_strided_slice %171 {offsets = [0, 64], sizes = [2, 32], strides = [1, 1]} : vector<2x128xf32> to vector<2x32xf32>
    %185 = math.tanh %184 : vector<2x32xf32>
    %186 = vector.extract_strided_slice %171 {offsets = [0, 96], sizes = [2, 32], strides = [1, 1]} : vector<2x128xf32> to vector<2x32xf32>
    %187 = arith.negf %186 : vector<2x32xf32>
    %188 = math.exp %187 : vector<2x32xf32>
    %cst_62 = arith.constant 1.000000e+00 : f32
    %189 = vector.broadcast %cst_62 : f32 to vector<2x32xf32>
    %190 = arith.addf %189, %188 : vector<2x32xf32>
    %191 = arith.divf %189, %190 : vector<2x32xf32>
    %192 = arith.mulf %183, %155 : vector<2x32xf32>
    %193 = arith.mulf %177, %185 : vector<2x32xf32>
    %194 = arith.addf %192, %193 : vector<2x32xf32>
    %195 = math.tanh %194 : vector<2x32xf32>
    %196 = arith.mulf %191, %195 : vector<2x32xf32>
    %197 = arith.truncf %196 : vector<2x32xf32> to vector<2x32xbf16>
    %c0_63 = arith.constant 0 : index
    %198 = arith.index_cast %165 : i32 to index
    %c0_64 = arith.constant 0 : index
    %c0_65 = arith.constant 0 : index
    %199 = vector.load %arg4[%c0_63, %198, %c0_64, %c0_65] : memref<1x8x2x32xbf16, #tpu.memory_space<vmem>>, vector<1x1x2x32xbf16>
    %200 = vector.shape_cast %199 : vector<1x1x2x32xbf16> to vector<2x32xbf16>
    %201 = vector.shape_cast %197 : vector<2x32xbf16> to vector<1x1x2x32xbf16>
    tpu.vector_store %arg4[%c0_63, %198, %c0_64, %c0_65], %201 {strides = array<i32>} : memref<1x8x2x32xbf16, #tpu.memory_space<vmem>>, vector<1x1x2x32xbf16>,
    %c5_i32 = arith.constant 5 : i32
    %c0_i32_66 = arith.constant 0 : i32
    %202 = arith.cmpi eq, %arg0, %c0_i32_66 : i32
    %c7_i32_67 = arith.constant 7 : i32
    %203 = arith.subi %c7_i32_67, %c5_i32 : i32
    %204 = arith.select %202, %c5_i32, %203 : i32
    %c0_68 = arith.constant 0 : index
    %205 = arith.index_cast %204 : i32 to index
    %c0_69 = arith.constant 0 : index
    %c0_70 = arith.constant 0 : index
    %206 = vector.load %arg2[%c0_68, %205, %c0_69, %c0_70] : memref<1x8x2x128xbf16, #tpu.memory_space<vmem>>, vector<1x1x2x128xbf16>
    %207 = vector.shape_cast %206 : vector<1x1x2x128xbf16> to vector<2x128xbf16>
    %208 = arith.extf %207 : vector<2x128xbf16> to vector<2x128xf32>
    %cst_71 = arith.constant dense<0.000000e+00> : vector<2x128xf32>
    %209 = tpu.matmul %197, %4, %cst_71 {dimension_numbers = #tpu.dot_dimension_numbers<[1], [0], [0], [1], [0, 0, 1, 1], [], []>} : vector<2x32xbf16>, vector<32x128xbf16>, vector<2x128xf32> -> vector<2x128xf32>
    %210 = arith.addf %208, %209 : vector<2x128xf32>
    %211 = vector.extract_strided_slice %210 {offsets = [0, 0], sizes = [2, 32], strides = [1, 1]} : vector<2x128xf32> to vector<2x32xf32>
    %212 = arith.negf %211 : vector<2x32xf32>
    %213 = math.exp %212 : vector<2x32xf32>
    %cst_72 = arith.constant 1.000000e+00 : f32
    %214 = vector.broadcast %cst_72 : f32 to vector<2x32xf32>
    %215 = arith.addf %214, %213 : vector<2x32xf32>
    %216 = arith.divf %214, %215 : vector<2x32xf32>
    %217 = vector.extract_strided_slice %210 {offsets = [0, 32], sizes = [2, 32], strides = [1, 1]} : vector<2x128xf32> to vector<2x32xf32>
    %218 = arith.negf %217 : vector<2x32xf32>
    %219 = math.exp %218 : vector<2x32xf32>
    %cst_73 = arith.constant 1.000000e+00 : f32
    %220 = vector.broadcast %cst_73 : f32 to vector<2x32xf32>
    %221 = arith.addf %220, %219 : vector<2x32xf32>
    %222 = arith.divf %220, %221 : vector<2x32xf32>
    %223 = vector.extract_strided_slice %210 {offsets = [0, 64], sizes = [2, 32], strides = [1, 1]} : vector<2x128xf32> to vector<2x32xf32>
    %224 = math.tanh %223 : vector<2x32xf32>
    %225 = vector.extract_strided_slice %210 {offsets = [0, 96], sizes = [2, 32], strides = [1, 1]} : vector<2x128xf32> to vector<2x32xf32>
    %226 = arith.negf %225 : vector<2x32xf32>
    %227 = math.exp %226 : vector<2x32xf32>
    %cst_74 = arith.constant 1.000000e+00 : f32
    %228 = vector.broadcast %cst_74 : f32 to vector<2x32xf32>
    %229 = arith.addf %228, %227 : vector<2x32xf32>
    %230 = arith.divf %228, %229 : vector<2x32xf32>
    %231 = arith.mulf %222, %194 : vector<2x32xf32>
    %232 = arith.mulf %216, %224 : vector<2x32xf32>
    %233 = arith.addf %231, %232 : vector<2x32xf32>
    %234 = math.tanh %233 : vector<2x32xf32>
    %235 = arith.mulf %230, %234 : vector<2x32xf32>
    %236 = arith.truncf %235 : vector<2x32xf32> to vector<2x32xbf16>
    %c0_75 = arith.constant 0 : index
    %237 = arith.index_cast %204 : i32 to index
    %c0_76 = arith.constant 0 : index
    %c0_77 = arith.constant 0 : index
    %238 = vector.load %arg4[%c0_75, %237, %c0_76, %c0_77] : memref<1x8x2x32xbf16, #tpu.memory_space<vmem>>, vector<1x1x2x32xbf16>
    %239 = vector.shape_cast %238 : vector<1x1x2x32xbf16> to vector<2x32xbf16>
    %240 = vector.shape_cast %236 : vector<2x32xbf16> to vector<1x1x2x32xbf16>
    tpu.vector_store %arg4[%c0_75, %237, %c0_76, %c0_77], %240 {strides = array<i32>} : memref<1x8x2x32xbf16, #tpu.memory_space<vmem>>, vector<1x1x2x32xbf16>,
    %c6_i32 = arith.constant 6 : i32
    %c0_i32_78 = arith.constant 0 : i32
    %241 = arith.cmpi eq, %arg0, %c0_i32_78 : i32
    %c7_i32_79 = arith.constant 7 : i32
    %242 = arith.subi %c7_i32_79, %c6_i32 : i32
    %243 = arith.select %241, %c6_i32, %242 : i32
    %c0_80 = arith.constant 0 : index
    %244 = arith.index_cast %243 : i32 to index
    %c0_81 = arith.constant 0 : index
    %c0_82 = arith.constant 0 : index
    %245 = vector.load %arg2[%c0_80, %244, %c0_81, %c0_82] : memref<1x8x2x128xbf16, #tpu.memory_space<vmem>>, vector<1x1x2x128xbf16>
    %246 = vector.shape_cast %245 : vector<1x1x2x128xbf16> to vector<2x128xbf16>
    %247 = arith.extf %246 : vector<2x128xbf16> to vector<2x128xf32>
    %cst_83 = arith.constant dense<0.000000e+00> : vector<2x128xf32>
    %248 = tpu.matmul %236, %4, %cst_83 {dimension_numbers = #tpu.dot_dimension_numbers<[1], [0], [0], [1], [0, 0, 1, 1], [], []>} : vector<2x32xbf16>, vector<32x128xbf16>, vector<2x128xf32> -> vector<2x128xf32>
    %249 = arith.addf %247, %248 : vector<2x128xf32>
    %250 = vector.extract_strided_slice %249 {offsets = [0, 0], sizes = [2, 32], strides = [1, 1]} : vector<2x128xf32> to vector<2x32xf32>
    %251 = arith.negf %250 : vector<2x32xf32>
    %252 = math.exp %251 : vector<2x32xf32>
    %cst_84 = arith.constant 1.000000e+00 : f32
    %253 = vector.broadcast %cst_84 : f32 to vector<2x32xf32>
    %254 = arith.addf %253, %252 : vector<2x32xf32>
    %255 = arith.divf %253, %254 : vector<2x32xf32>
    %256 = vector.extract_strided_slice %249 {offsets = [0, 32], sizes = [2, 32], strides = [1, 1]} : vector<2x128xf32> to vector<2x32xf32>
    %257 = arith.negf %256 : vector<2x32xf32>
    %258 = math.exp %257 : vector<2x32xf32>
    %cst_85 = arith.constant 1.000000e+00 : f32
    %259 = vector.broadcast %cst_85 : f32 to vector<2x32xf32>
    %260 = arith.addf %259, %258 : vector<2x32xf32>
    %261 = arith.divf %259, %260 : vector<2x32xf32>
    %262 = vector.extract_strided_slice %249 {offsets = [0, 64], sizes = [2, 32], strides = [1, 1]} : vector<2x128xf32> to vector<2x32xf32>
    %263 = math.tanh %262 : vector<2x32xf32>
    %264 = vector.extract_strided_slice %249 {offsets = [0, 96], sizes = [2, 32], strides = [1, 1]} : vector<2x128xf32> to vector<2x32xf32>
    %265 = arith.negf %264 : vector<2x32xf32>
    %266 = math.exp %265 : vector<2x32xf32>
    %cst_86 = arith.constant 1.000000e+00 : f32
    %267 = vector.broadcast %cst_86 : f32 to vector<2x32xf32>
    %268 = arith.addf %267, %266 : vector<2x32xf32>
    %269 = arith.divf %267, %268 : vector<2x32xf32>
    %270 = arith.mulf %261, %233 : vector<2x32xf32>
    %271 = arith.mulf %255, %263 : vector<2x32xf32>
    %272 = arith.addf %270, %271 : vector<2x32xf32>
    %273 = math.tanh %272 : vector<2x32xf32>
    %274 = arith.mulf %269, %273 : vector<2x32xf32>
    %275 = arith.truncf %274 : vector<2x32xf32> to vector<2x32xbf16>
    %c0_87 = arith.constant 0 : index
    %276 = arith.index_cast %243 : i32 to index
    %c0_88 = arith.constant 0 : index
    %c0_89 = arith.constant 0 : index
    %277 = vector.load %arg4[%c0_87, %276, %c0_88, %c0_89] : memref<1x8x2x32xbf16, #tpu.memory_space<vmem>>, vector<1x1x2x32xbf16>
    %278 = vector.shape_cast %277 : vector<1x1x2x32xbf16> to vector<2x32xbf16>
    %279 = vector.shape_cast %275 : vector<2x32xbf16> to vector<1x1x2x32xbf16>
    tpu.vector_store %arg4[%c0_87, %276, %c0_88, %c0_89], %279 {strides = array<i32>} : memref<1x8x2x32xbf16, #tpu.memory_space<vmem>>, vector<1x1x2x32xbf16>,
    %c7_i32_90 = arith.constant 7 : i32
    %c0_i32_91 = arith.constant 0 : i32
    %280 = arith.cmpi eq, %arg0, %c0_i32_91 : i32
    %c7_i32_92 = arith.constant 7 : i32
    %281 = arith.subi %c7_i32_92, %c7_i32_90 : i32
    %282 = arith.select %280, %c7_i32_90, %281 : i32
    %c0_93 = arith.constant 0 : index
    %283 = arith.index_cast %282 : i32 to index
    %c0_94 = arith.constant 0 : index
    %c0_95 = arith.constant 0 : index
    %284 = vector.load %arg2[%c0_93, %283, %c0_94, %c0_95] : memref<1x8x2x128xbf16, #tpu.memory_space<vmem>>, vector<1x1x2x128xbf16>
    %285 = vector.shape_cast %284 : vector<1x1x2x128xbf16> to vector<2x128xbf16>
    %286 = arith.extf %285 : vector<2x128xbf16> to vector<2x128xf32>
    %cst_96 = arith.constant dense<0.000000e+00> : vector<2x128xf32>
    %287 = tpu.matmul %275, %4, %cst_96 {dimension_numbers = #tpu.dot_dimension_numbers<[1], [0], [0], [1], [0, 0, 1, 1], [], []>} : vector<2x32xbf16>, vector<32x128xbf16>, vector<2x128xf32> -> vector<2x128xf32>
    %288 = arith.addf %286, %287 : vector<2x128xf32>
    %289 = vector.extract_strided_slice %288 {offsets = [0, 0], sizes = [2, 32], strides = [1, 1]} : vector<2x128xf32> to vector<2x32xf32>
    %290 = arith.negf %289 : vector<2x32xf32>
    %291 = math.exp %290 : vector<2x32xf32>
    %cst_97 = arith.constant 1.000000e+00 : f32
    %292 = vector.broadcast %cst_97 : f32 to vector<2x32xf32>
    %293 = arith.addf %292, %291 : vector<2x32xf32>
    %294 = arith.divf %292, %293 : vector<2x32xf32>
    %295 = vector.extract_strided_slice %288 {offsets = [0, 32], sizes = [2, 32], strides = [1, 1]} : vector<2x128xf32> to vector<2x32xf32>
    %296 = arith.negf %295 : vector<2x32xf32>
    %297 = math.exp %296 : vector<2x32xf32>
    %cst_98 = arith.constant 1.000000e+00 : f32
    %298 = vector.broadcast %cst_98 : f32 to vector<2x32xf32>
    %299 = arith.addf %298, %297 : vector<2x32xf32>
    %300 = arith.divf %298, %299 : vector<2x32xf32>
    %301 = vector.extract_strided_slice %288 {offsets = [0, 64], sizes = [2, 32], strides = [1, 1]} : vector<2x128xf32> to vector<2x32xf32>
    %302 = math.tanh %301 : vector<2x32xf32>
    %303 = vector.extract_strided_slice %288 {offsets = [0, 96], sizes = [2, 32], strides = [1, 1]} : vector<2x128xf32> to vector<2x32xf32>
    %304 = arith.negf %303 : vector<2x32xf32>
    %305 = math.exp %304 : vector<2x32xf32>
    %cst_99 = arith.constant 1.000000e+00 : f32
    %306 = vector.broadcast %cst_99 : f32 to vector<2x32xf32>
    %307 = arith.addf %306, %305 : vector<2x32xf32>
    %308 = arith.divf %306, %307 : vector<2x32xf32>
    %309 = arith.mulf %300, %272 : vector<2x32xf32>
    %310 = arith.mulf %294, %302 : vector<2x32xf32>
    %311 = arith.addf %309, %310 : vector<2x32xf32>
    %312 = math.tanh %311 : vector<2x32xf32>
    %313 = arith.mulf %308, %312 : vector<2x32xf32>
    %314 = arith.truncf %313 : vector<2x32xf32> to vector<2x32xbf16>
    %c0_100 = arith.constant 0 : index
    %315 = arith.index_cast %282 : i32 to index
    %c0_101 = arith.constant 0 : index
    %c0_102 = arith.constant 0 : index
    %316 = vector.load %arg4[%c0_100, %315, %c0_101, %c0_102] : memref<1x8x2x32xbf16, #tpu.memory_space<vmem>>, vector<1x1x2x32xbf16>
    %317 = vector.shape_cast %316 : vector<1x1x2x32xbf16> to vector<2x32xbf16>
    %318 = vector.shape_cast %314 : vector<2x32xbf16> to vector<1x1x2x32xbf16>
    tpu.vector_store %arg4[%c0_100, %315, %c0_101, %c0_102], %318 {strides = array<i32>} : memref<1x8x2x32xbf16, #tpu.memory_space<vmem>>, vector<1x1x2x32xbf16>,
    %c8_i32 = arith.constant 8 : i32
    %c0_103 = arith.constant 0 : index
    %c0_104 = arith.constant 0 : index
    %319 = vector.load %arg7[%c0_103, %c0_104] : memref<2x32xbf16, #tpu.memory_space<vmem>>, vector<2x32xbf16>
    tpu.vector_store %arg7[%c0_103, %c0_104], %314 {strides = array<i32>} : memref<2x32xbf16, #tpu.memory_space<vmem>>, vector<2x32xbf16>,
    %c0_105 = arith.constant 0 : index
    %c0_106 = arith.constant 0 : index
    %320 = vector.load %arg8[%c0_105, %c0_106] : memref<2x32xf32, #tpu.memory_space<vmem>>, vector<2x32xf32>
    tpu.vector_store %arg8[%c0_105, %c0_106], %311 {strides = array<i32>} : memref<2x32xf32, #tpu.memory_space<vmem>>, vector<2x32xf32>,
    %321 = arith.extf %314 : vector<2x32xbf16> to vector<2x32xf32>
    %c0_107 = arith.constant 0 : index
    %c0_108 = arith.constant 0 : index
    %c0_109 = arith.constant 0 : index
    %322 = vector.load %arg5[%c0_107, %c0_108, %c0_109] : memref<1x2x32xf32, #tpu.memory_space<vmem>>, vector<1x2x32xf32>
    %323 = vector.shape_cast %322 : vector<1x2x32xf32> to vector<2x32xf32>
    %324 = vector.shape_cast %321 : vector<2x32xf32> to vector<1x2x32xf32>
    tpu.vector_store %arg5[%c0_107, %c0_108, %c0_109], %324 {strides = array<i32>} : memref<1x2x32xf32, #tpu.memory_space<vmem>>, vector<1x2x32xf32>,
    %c0_110 = arith.constant 0 : index
    %c0_111 = arith.constant 0 : index
    %c0_112 = arith.constant 0 : index
    %325 = vector.load %arg6[%c0_110, %c0_111, %c0_112] : memref<1x2x32xf32, #tpu.memory_space<vmem>>, vector<1x2x32xf32>
    %326 = vector.shape_cast %325 : vector<1x2x32xf32> to vector<2x32xf32>
    %327 = vector.shape_cast %311 : vector<2x32xf32> to vector<1x2x32xf32>
    tpu.vector_store %arg6[%c0_110, %c0_111, %c0_112], %327 {strides = array<i32>} : memref<1x2x32xf32, #tpu.memory_space<vmem>>, vector<1x2x32xf32>,
    return
  }
  func.func @transform_0(%arg0: i32, %arg1: i32) -> (i32, i32, i32, i32) {
    %c1_i32 = arith.constant 1 : i32
    %0 = arith.subi %c1_i32, %arg0 : i32
    %1 = arith.muli %0, %arg1 : i32
    %c0_i32 = arith.constant 0 : i32
    %2 = arith.subi %c0_i32, %arg1 : i32
    %3 = arith.muli %arg0, %2 : i32
    %4 = arith.addi %1, %3 : i32
    %c0_i32_0 = arith.constant 0 : i32
    %c0_i32_1 = arith.constant 0 : i32
    %c0_i32_2 = arith.constant 0 : i32
    return %arg0, %4, %c0_i32_0, %c0_i32_1 : i32, i32, i32, i32
  }
  func.func @transform_1(%arg0: i32, %arg1: i32) -> (i32, i32, i32) {
    %c0_i32 = arith.constant 0 : i32
    %c0_i32_0 = arith.constant 0 : i32
    %c0_i32_1 = arith.constant 0 : i32
    return %arg0, %c0_i32, %c0_i32_0 : i32, i32, i32
  }
  func.func @transform_2(%arg0: i32, %arg1: i32) -> (i32, i32, i32, i32) {
    %c1_i32 = arith.constant 1 : i32
    %0 = arith.subi %c1_i32, %arg0 : i32
    %1 = arith.muli %0, %arg1 : i32
    %c0_i32 = arith.constant 0 : i32
    %2 = arith.subi %c0_i32, %arg1 : i32
    %3 = arith.muli %arg0, %2 : i32
    %4 = arith.addi %1, %3 : i32
    %c0_i32_0 = arith.constant 0 : i32
    %c0_i32_1 = arith.constant 0 : i32
    %c0_i32_2 = arith.constant 0 : i32
    return %arg0, %4, %c0_i32_0, %c0_i32_1 : i32, i32, i32, i32
  }
  func.func @transform_3(%arg0: i32, %arg1: i32) -> (i32, i32, i32) {
    %c0_i32 = arith.constant 0 : i32
    %c0_i32_0 = arith.constant 0 : i32
    %c0_i32_1 = arith.constant 0 : i32
    return %arg0, %c0_i32, %c0_i32_0 : i32, i32, i32
  }
  func.func @transform_4(%arg0: i32, %arg1: i32) -> (i32, i32, i32) {
    %c0_i32 = arith.constant 0 : i32
    %c0_i32_0 = arith.constant 0 : i32
    %c0_i32_1 = arith.constant 0 : i32
    return %arg0, %c0_i32, %c0_i32_0 : i32, i32, i32
  }
}

</mosaic_0001>

<bundles_post_ra>
// kernel: encoder_forward.2
= control target key start
LH: loop header
LB: loop body
LE: loop exit
PB: predicated region body
PF: predicated region fallthrough
CT: control target
= control target key end

     0   :  { %s1612_s15 = smov 0   ;;  %s1614_s16 = smov 0   ;;  %s1880_s0 = inlined_call_operand.vmem [shape: bf16[2,8,2,128], index: 0, kind: input, shape index: {}]   ;;  %s1881_s1 = inlined_call_operand.vmem [shape: bf16[2,32,128], index: 1, kind: input, shape index: {}]   ;;  %s1882_s2 = inlined_call_operand.vmem [shape: bf16[2,8,2,32], index: 2, kind: output, shape index: {0}]   ;;  %s1883_s3 = inlined_call_operand.vmem [shape: f32[2,2,32], index: 3, kind: output, shape index: {1}]   ;;  %s1884_s4 = inlined_call_operand.vmem [shape: f32[2,2,32], index: 4, kind: output, shape index: {2}]  }
   0x1   :  { %s1616_s17 = smov 0  }
   0x2 LB: > { %s27_s18 = sadd.s32 1, %s1573_s16  ;;  %p1340_p0 = scmp.ge.s32.totalorder %s1577_s17, 1  ;;  %s1577_s17 = sphi %s1616_s17, %s15_s17   ;;  %s1573_s16 = sphi %s1614_s16, %s1886_s16   ;;  %s1569_s15 = sphi %s1612_s15, %s1885_s15  }
   0x3   : > { %p29_p1 = scmp.ge.s32.totalorder %s27_s18, 2  ;;  %p227_p2 = scmp.lt.s32.totalorder %s1577_s17, 3 }
   0x5   : > { %s1888_s18 = smov (%p29_p1, %s27_s18), 0  ;;  %p228_p3 = pnand %p1340_p0, %p227_p2 }
   0x6   : > { %p288_p4 = scmp.lt.s32.totalorder (!%p228_p3), %s1569_s15, 1  ;;  %vm338_vm0 = vcmask (!%p228_p3), 253952   ;;  %v1579_v0 = vmov (!%p228_p3), 0.0   ;;  %vm1580_vm1 = vmmov (!%p228_p3), 0   ;;  %v1581_v1 = vmov (!%p228_p3), 0   ;;  %p348_p5 = scmp.eq.s32.totalorder (!%p228_p3), %s1569_s15, 0 }
   0x7   : > { %231 = sbr.rel (%p228_p3) target bundleno = 5667 (0x1623), region = 28  ;;  %1393 = vmatprep.subr.bf16.mxu0 (!%p228_p3), %v1579_v0  ;;  %1397 = vmatprep.mubr.msk.bf16.mxu0 (!%p228_p3), %vm1580_vm1, %v1579_v0  ;;  %339 = vst.msk [vmem:[#allocation2] sm:$0x1] (!%p228_p3), %vm338_vm0, %v1581_v1  ;;  %vm365_vm2 = vcmask (!%p228_p3), 261120   ;;  %vm340_vm3 = vcmask (!%p228_p3), 254976   ;;  %s1582_s30 = smov (!%p228_p3), 64  }
   0x8   : > { %1401 = vmatprep.subr.bf16.mxu1 (!%p228_p3), %v1579_v0  ;;  %1405 = vmatprep.mubr.msk.bf16.mxu1 (!%p228_p3), %vm1580_vm1, %v1579_v0  ;;  %341 = vst.msk [vmem:[#allocation3] sm:$0x3] (!%p228_p3), %vm340_vm3, %v1579_v0  ;;  %s1583_s5 = smov (!%p228_p3), 32  }
   0xe   : > { %s1638_s19 = scalar_select %p288_p4, %s1569_s15, 1  ;;  %v346_v4 = vld [vmem:[#allocation2] sm:$0x1] }
   0xf   : > { %s1672_s25 = scalar_select %p348_p5, 0, 7  ;;  %v1351_v13 = vld.sshfl [vmem:[#allocation3] sm:$0x3 pattern:$0x76325410] }
  0x10   : > { %s1368_s20 = sshll.u32 %s1638_s19, 4  ;;  %s1341_s24 = sshll.u32 %s1638_s19, 3 }
  0x11   : > { %s305_s23 = scalar_lea.vmem %s1881_s1, %s1368_s20  ;;  %s1679_s28 = scalar_lea.vmem %s1880_s0, %s1341_s24 }
  0x12   : > { %v1647_v2 = vld [vmem:[%s305_s23] sm:$0xff]   ;;  %v1650_v3 = vld [vmem:[%s305_s23 + $0x8] sm:$0xff]   ;;  %s350_s29 = scalar_lea.vmem %s1679_s28, %s1672_s25 }
  0x13   : > { %1394 = vmatpush3.bf16.msra.mxu0 %v1647_v2  ;;  %1402 = vmatpush3.bf16.msra.mxu1 %v1647_v2  ;;  %v351_v5 = vld [vmem:[%s350_s29] sm:$0x1]  ;;  %s1700_s6 = scalar_select %p348_p5, 1, 6 }
  0x14   : > { %1395 = vmatprep.subr.bf16.mxu0 %v1579_v0  ;;  %1403 = vmatprep.subr.bf16.mxu1 %v1579_v0  ;;  %v352_v6 = vunpack.c.l.bf16 %v351_v5  ;;  %s1720_s8 = scalar_select %p348_p5, 2, 5 }
  0x15   : > { %s468_s7 = scalar_lea.vmem %s1679_s28, %s1700_s6 }
  0x16   : > { %v469_v29 = vld [vmem:[%s468_s7] sm:$0x1]  ;;  %s563_s9 = scalar_lea.vmem %s1679_s28, %s1720_s8  ;;  %s1586_s7 = smov 96  }
  0x17   : > { %1396 = vmatpush3.bf16.msra.mxu0 %v1650_v3  ;;  %1404 = vmatpush3.bf16.msra.mxu1 %v1650_v3  ;;  %v470_v30 = vunpack.c.l.bf16 %v469_v29  ;;  %v564_v51 = vld [vmem:[%s563_s9] sm:$0x1]  ;;  %s1740_s10 = scalar_select %p348_p5, 3, 4 }
  0x18   : > { %1409 = vmatprep.subr.bf16.mxu0 %v1579_v0  ;;  %1417 = vmatprep.subr.bf16.mxu1 %v1579_v0  ;;  %v565_v52 = vunpack.c.l.bf16 %v564_v51  ;;  %s1759_s12 = scalar_select %p348_p5, 4, 3 }
  0x19   : > { %s658_s11 = scalar_lea.vmem %s1679_s28, %s1740_s10 }
  0x1a   : > { %1398 = vmatmul.mubr.msk.bf16.vlgmr.msra.gmra.mrb[0].mxu0 %vm365_vm2, %v346_v4  ;;  %s753_s13 = scalar_lea.vmem %s1679_s28, %s1759_s12 }
  0x1b   : > { %1410 = vmatpush3.bf16.msra.mxu0 %v1647_v2  ;;  %1413 = vmatprep.mubr.msk.bf16.mxu0 %vm1580_vm1, %v1579_v0  ;;  %s1778_s14 = scalar_select %p348_p5, 5, 2 }
  0x1c   : > { %1411 = vmatprep.subr.bf16.mxu0 %v1579_v0  ;;  %s1792_s21 = scalar_select %p348_p5, 6, 1 }
  0x1d   : > { %s848_s20 = scalar_lea.vmem %s1679_s28, %s1778_s14 }
  0x1e   : > { %s943_s22 = scalar_lea.vmem %s1679_s28, %s1792_s21 }
  0x1f   : > { %1412 = vmatpush3.bf16.msra.mxu0 %v1650_v3  ;;  %s1803_s23 = scalar_select %p348_p5, 7, 0 }
  0x20   : > { %1425 = vmatprep.subr.bf16.mxu0 %v1579_v0 }
  0x21   : > { %s1038_s26 = scalar_lea.vmem %s1679_s28, %s1803_s23  ;;  %s1821_s28 = scalar_lea.vmem %s1882_s2, %s1341_s24 }
  0x22   : > { %s464_s29 = scalar_lea.vmem %s1821_s28, %s1672_s25  ;;  %s1345_s24 = sshll.u32 %s1638_s19, 1 }
  0x23   : > { %s332_s9 = scalar_lea.vmem %s1884_s4, %s1345_s24 }
  0xed   : > { %v403_v7 = vpop.f32.mrb[0].mxu0 }
  0xee   : > { %v409_v8 = vadd.f32 %v403_v7, %v352_v6  ;;  %v1399_v9 = vpop.f32.mrb[1].mxu0 }
  0xef   : > { %v406_v10 = vpop.f32.mrb[2].mxu0 }
  0xf0   : > { %1491 = vtanh.f32 %v409_v8  ;;  %v1400_v11 = vpop.f32.mrb[3].mxu0  ;;  %v1350_v14 = vmul.f32 -1.442695, %v409_v8 }
  0xf2   : > { %1493 = vpow2.f32 %v1350_v14 }
  0xfa   : > { %v1492_v12 = vpop.eup %1491 }
  0xfb   : > { %430 = vrot.lane.b32.xlu0 %v1492_v12, %s1582_s30  ;;  %v659_v12 = vld [vmem:[%s658_s11] sm:$0x1]  ;;  %s560_s11 = scalar_lea.vmem %s1821_s28, %s1700_s6  ;;  %s940_s6 = scalar_lea.vmem %s1821_s28, %s1778_s14 }
  0xfc   : > { %v1494_v15 = vpop.eup %1493 }
  0xfd   : > { %v413_v16 = vadd.f32 1.0, %v1494_v15 }
  0xff   : > { %425 = vrot.lane.b32.xlu0 %v1351_v13, %s1583_s5  ;;  %1495 = vrcp.f32 %v413_v16  ;;  %v660_v13 = vunpack.c.l.bf16 %v659_v12 }
 0x109   : > { %v1496_v17 = vpop.eup %1495 }
 0x16d   : > { %v431_v18 = vpop.permute.xlu0 %430 }
 0x16e   : > { %v433_v19 = vmul.f32 %v1496_v17, %v431_v18 }
 0x170   : > { %435 = vrot.lane.b32.xlu1 %v433_v19, %s1583_s5 }
 0x171   : > { %v426_v20 = vpop.permute.xlu0 %425 }
 0x172   : > { %v428_v21 = vmul.f32 %v1496_v17, %v426_v20 }
 0x1e2   : > { %v436_v22 = vpop.permute.xlu1 %435 }
 0x1e3   : > { %v438_v23 = vadd.f32 %v436_v22, %v428_v21 }
 0x1e5   : > { %1497 = vtanh.f32 %v438_v23 }
 0x1ef   : > { %v1498_v24 = vpop.eup %1497 }
 0x1f0   : > { %441 = vrot.lane.b32.xlu1 %v1498_v24, %s1582_s30 }
 0x262   : > { %v442_v25 = vpop.permute.xlu1 %441 }
 0x263   : > { %v444_v26 = vmul.f32 %v1496_v17, %v442_v25 }
 0x265   : > { %v1687_v27 = vpack.c.bf16 %v444_v26, %v444_v26 }
 0x267   : > { %471 = vrot.lane.b32.xlu0 %v1687_v27, %s1583_s5 }
 0x2d9   : > { %v472_v28 = vpop.permute.xlu0 %471 }
 0x2da   : > { %1406 = vmatmul.mubr.msk.bf16.vlgmr.msra.gmra.mrb[0].mxu1 %vm365_vm2, %v472_v28 }
 0x2db   : > { %1418 = vmatpush3.bf16.msra.mxu1 %v1647_v2  ;;  %1421 = vmatprep.mubr.msk.bf16.mxu1 %vm1580_vm1, %v1579_v0 }
 0x2dc   : > { %1419 = vmatprep.subr.bf16.mxu1 %v1579_v0 }
 0x2df   : > { %1420 = vmatpush3.bf16.msra.mxu1 %v1650_v3 }
 0x2e0   : > { %1433 = vmatprep.subr.bf16.mxu1 %v1579_v0 }
 0x3ad   : > { %v510_v31 = vpop.f32.mrb[0].mxu1 }
 0x3ae   : > { %v516_v32 = vadd.f32 %v510_v31, %v470_v30  ;;  %v1407_v33 = vpop.f32.mrb[1].mxu1 }
 0x3af   : > { %v513_v34 = vpop.f32.mrb[2].mxu1 }
 0x3b0   : > { %1499 = vtanh.f32 %v516_v32  ;;  %v1408_v35 = vpop.f32.mrb[3].mxu1  ;;  %v1353_v37 = vmul.f32 -1.442695, %v516_v32 }
 0x3b1   : > { %v754_v35 = vld [vmem:[%s753_s13] sm:$0x1]  ;;  %s655_s13 = scalar_lea.vmem %s1821_s28, %s1720_s8  ;;  %s1035_s8 = scalar_lea.vmem %s1821_s28, %s1792_s21 }
 0x3b2   : > { %1501 = vpow2.f32 %v1353_v37 }
 0x3ba   : > { %v1500_v36 = vpop.eup %1499 }
 0x3bb   : > { %526 = vrot.lane.b32.xlu1 %v1500_v36, %s1582_s30  ;;  %v755_v36 = vunpack.c.l.bf16 %v754_v35 }
 0x3bc   : > { %v1502_v38 = vpop.eup %1501 }
 0x3bd   : > { %v520_v39 = vadd.f32 1.0, %v1502_v38 }
 0x3bf   : > { %1503 = vrcp.f32 %v520_v39 }
 0x3c9   : > { %v1504_v40 = vpop.eup %1503 }
 0x3ca   : > { %v524_v43 = vmul.f32 %v1504_v40, %v438_v23 }
 0x42d   : > { %v527_v41 = vpop.permute.xlu1 %526 }
 0x42e   : > { %v529_v42 = vmul.f32 %v1504_v40, %v527_v41 }
 0x430   : > { %531 = vrot.lane.b32.xlu0 %v529_v42, %s1583_s5 }
 0x4a2   : > { %v532_v44 = vpop.permute.xlu0 %531 }
 0x4a3   : > { %v534_v45 = vadd.f32 %v532_v44, %v524_v43 }
 0x4a5   : > { %1505 = vtanh.f32 %v534_v45 }
 0x4af   : > { %v1506_v46 = vpop.eup %1505 }
 0x4b0   : > { %537 = vrot.lane.b32.xlu1 %v1506_v46, %s1582_s30 }
 0x522   : > { %v538_v47 = vpop.permute.xlu1 %537 }
 0x523   : > { %v540_v48 = vmul.f32 %v1504_v40, %v538_v47 }
 0x525   : > { %v1707_v49 = vpack.c.bf16 %v540_v48, %v540_v48 }
 0x527   : > { %566 = vrot.lane.b32.xlu0 %v1707_v49, %s1583_s5 }
 0x599   : > { %v567_v50 = vpop.permute.xlu0 %566 }
 0x59a   : > { %1414 = vmatmul.mubr.msk.bf16.vlgmr.msra.gmra.mrb[4].mxu0 %vm365_vm2, %v567_v50 }
 0x59b   : > { %1426 = vmatpush3.bf16.msra.mxu0 %v1647_v2  ;;  %1429 = vmatprep.mubr.msk.bf16.mxu0 %vm1580_vm1, %v1579_v0 }
 0x59c   : > { %1427 = vmatprep.subr.bf16.mxu0 %v1579_v0 }
 0x59f   : > { %1428 = vmatpush3.bf16.msra.mxu0 %v1650_v3 }
 0x5a0   : > { %1441 = vmatprep.subr.bf16.mxu0 %v1579_v0 }
 0x66d   : > { %v605_v53 = vpop.f32.mrb[4].mxu0 }
 0x66e   : > { %v611_v54 = vadd.f32 %v605_v53, %v565_v52  ;;  %v1415_v55 = vpop.f32.mrb[5].mxu0 }
 0x66f   : > { %v608_v56 = vpop.f32.mrb[6].mxu0 }
 0x670   : > { %1507 = vtanh.f32 %v611_v54  ;;  %v1416_v57 = vpop.f32.mrb[7].mxu0  ;;  %v1355_v59 = vmul.f32 -1.442695, %v611_v54 }
 0x672   : > { %1509 = vpow2.f32 %v1355_v59 }
 0x67a   : > { %v1508_v58 = vpop.eup %1507 }
 0x67b   : > { %621 = vrot.lane.b32.xlu1 %v1508_v58, %s1582_s30  ;;  %v849_v58 = vld [vmem:[%s848_s20] sm:$0x1]  ;;  %s750_s20 = scalar_lea.vmem %s1821_s28, %s1740_s10  ;;  %s1130_s10 = scalar_lea.vmem %s1821_s28, %s1803_s23 }
 0x67c   : > { %v1510_v60 = vpop.eup %1509  ;;  %v850_v59 = vunpack.c.l.bf16 %v849_v58 }
 0x67d   : > { %v615_v61 = vadd.f32 1.0, %v1510_v60 }
 0x67f   : > { %1511 = vrcp.f32 %v615_v61 }
 0x689   : > { %v1512_v62 = vpop.eup %1511 }
 0x68a   : > { %v619_v4 = vmul.f32 %v1512_v62, %v534_v45 }
 0x6ed   : > { %v622_v63 = vpop.permute.xlu1 %621 }
 0x6ee   : > { %v624_v1 = vmul.f32 %v1512_v62, %v622_v63 }
 0x6f0   : > { %626 = vrot.lane.b32.xlu0 %v624_v1, %s1583_s5 }
 0x762   : > { %v627_v5 = vpop.permute.xlu0 %626 }
 0x763   : > { %v629_v6 = vadd.f32 %v627_v5, %v619_v4 }
 0x765   : > { %1513 = vtanh.f32 %v629_v6 }
 0x76f   : > { %v1514_v7 = vpop.eup %1513 }
 0x770   : > { %632 = vrot.lane.b32.xlu1 %v1514_v7, %s1582_s30 }
 0x7e2   : > { %v633_v8 = vpop.permute.xlu1 %632 }
 0x7e3   : > { %v635_v9 = vmul.f32 %v1512_v62, %v633_v8 }
 0x7e5   : > { %v1727_v10 = vpack.c.bf16 %v635_v9, %v635_v9 }
 0x7e7   : > { %661 = vrot.lane.b32.xlu0 %v1727_v10, %s1583_s5 }
 0x859   : > { %v662_v11 = vpop.permute.xlu0 %661 }
 0x85a   : > { %1422 = vmatmul.mubr.msk.bf16.vlgmr.msra.gmra.mrb[4].mxu1 %vm365_vm2, %v662_v11 }
 0x85b   : > { %1434 = vmatpush3.bf16.msra.mxu1 %v1647_v2  ;;  %1437 = vmatprep.mubr.msk.bf16.mxu1 %vm1580_vm1, %v1579_v0 }
 0x85c   : > { %1435 = vmatprep.subr.bf16.mxu1 %v1579_v0 }
 0x85f   : > { %1436 = vmatpush3.bf16.msra.mxu1 %v1650_v3 }
 0x860   : > { %1449 = vmatprep.subr.bf16.mxu1 %v1579_v0 }
 0x92d   : > { %v700_v14 = vpop.f32.mrb[4].mxu1 }
 0x92e   : > { %v706_v15 = vadd.f32 %v700_v14, %v660_v13  ;;  %v1423_v16 = vpop.f32.mrb[5].mxu1 }
 0x92f   : > { %v703_v17 = vpop.f32.mrb[6].mxu1 }
 0x930   : > { %1515 = vtanh.f32 %v706_v15  ;;  %v1424_v18 = vpop.f32.mrb[7].mxu1  ;;  %v1357_v20 = vmul.f32 -1.442695, %v706_v15  ;;  %v944_v17 = vld [vmem:[%s943_s22] sm:$0x1]  ;;  %s845_s22 = scalar_lea.vmem %s1821_s28, %s1759_s12 }
 0x931   : > { %v945_v18 = vunpack.c.l.bf16 %v944_v17 }
 0x932   : > { %1517 = vpow2.f32 %v1357_v20 }
 0x93a   : > { %v1516_v19 = vpop.eup %1515 }
 0x93b   : > { %716 = vrot.lane.b32.xlu1 %v1516_v19, %s1582_s30 }
 0x93c   : > { %v1518_v21 = vpop.eup %1517 }
 0x93d   : > { %v710_v22 = vadd.f32 1.0, %v1518_v21 }
 0x93f   : > { %1519 = vrcp.f32 %v710_v22 }
 0x949   : > { %v1520_v23 = vpop.eup %1519 }
 0x94a   : > { %v714_v26 = vmul.f32 %v1520_v23, %v629_v6 }
 0x9ad   : > { %v717_v24 = vpop.permute.xlu1 %716 }
 0x9ae   : > { %v719_v25 = vmul.f32 %v1520_v23, %v717_v24 }
 0x9b0   : > { %721 = vrot.lane.b32.xlu0 %v719_v25, %s1583_s5 }
 0xa22   : > { %v722_v28 = vpop.permute.xlu0 %721 }
 0xa23   : > { %v724_v29 = vadd.f32 %v722_v28, %v714_v26 }
 0xa25   : > { %1521 = vtanh.f32 %v724_v29 }
 0xa2f   : > { %v1522_v30 = vpop.eup %1521 }
 0xa30   : > { %727 = vrot.lane.b32.xlu1 %v1522_v30, %s1582_s30 }
 0xaa2   : > { %v728_v31 = vpop.permute.xlu1 %727 }
 0xaa3   : > { %v730_v32 = vmul.f32 %v1520_v23, %v728_v31 }
 0xaa5   : > { %v1747_v33 = vpack.c.bf16 %v730_v32, %v730_v32 }
 0xaa7   : > { %756 = vrot.lane.b32.xlu0 %v1747_v33, %s1583_s5 }
 0xb19   : > { %v757_v34 = vpop.permute.xlu0 %756 }
 0xb1a   : > { %1430 = vmatmul.mubr.msk.bf16.vlgmr.msra.gmra.mrb[8].mxu0 %vm365_vm2, %v757_v34 }
 0xb1b   : > { %1442 = vmatpush3.bf16.msra.mxu0 %v1647_v2  ;;  %1445 = vmatprep.mubr.msk.bf16.mxu0 %vm1580_vm1, %v1579_v0 }
 0xb1c   : > { %1443 = vmatprep.subr.bf16.mxu0 %v1579_v0 }
 0xb1f   : > { %1444 = vmatpush3.bf16.msra.mxu0 %v1650_v3 }
 0xbed   : > { %v795_v37 = vpop.f32.mrb[8].mxu0 }
 0xbee   : > { %v801_v38 = vadd.f32 %v795_v37, %v755_v36  ;;  %v1431_v39 = vpop.f32.mrb[9].mxu0 }
 0xbef   : > { %v798_v40 = vpop.f32.mrb[10].mxu0 }
 0xbf0   : > { %1523 = vtanh.f32 %v801_v38  ;;  %v1432_v41 = vpop.f32.mrb[11].mxu0  ;;  %v1359_v43 = vmul.f32 -1.442695, %v801_v38 }
 0xbf1   : > { %v1039_v41 = vld [vmem:[%s1038_s26] sm:$0x1]  ;;  %s328_s26 = scalar_lea.vmem %s1883_s3, %s1345_s24 }
 0xbf2   : > { %1525 = vpow2.f32 %v1359_v43 }
 0xbfa   : > { %v1524_v42 = vpop.eup %1523 }
 0xbfb   : > { %811 = vrot.lane.b32.xlu1 %v1524_v42, %s1582_s30  ;;  %v1040_v42 = vunpack.c.l.bf16 %v1039_v41 }
 0xbfc   : > { %v1526_v44 = vpop.eup %1525 }
 0xbfd   : > { %v805_v45 = vadd.f32 1.0, %v1526_v44 }
 0xbff   : > { %1527 = vrcp.f32 %v805_v45 }
 0xc09   : > { %v1528_v46 = vpop.eup %1527 }
 0xc0a   : > { %v809_v50 = vmul.f32 %v1528_v46, %v724_v29 }
 0xc6d   : > { %v812_v47 = vpop.permute.xlu1 %811 }
 0xc6e   : > { %v814_v48 = vmul.f32 %v1528_v46, %v812_v47 }
 0xc70   : > { %816 = vrot.lane.b32.xlu0 %v814_v48, %s1583_s5 }
 0xce2   : > { %v817_v51 = vpop.permute.xlu0 %816 }
 0xce3   : > { %v819_v52 = vadd.f32 %v817_v51, %v809_v50 }
 0xce5   : > { %1529 = vtanh.f32 %v819_v52 }
 0xcef   : > { %v1530_v53 = vpop.eup %1529 }
 0xcf0   : > { %822 = vrot.lane.b32.xlu1 %v1530_v53, %s1582_s30  ;;  %v1584_v53 = vmov 1966171168  }
 0xd62   : > { %v823_v54 = vpop.permute.xlu1 %822 }
 0xd63   : > { %v825_v55 = vmul.f32 %v1528_v46, %v823_v54  ;;  %v448_v54 = vunpack.c.l.s4 %v1584_v53 }
 0xd65   : > { %v1766_v56 = vpack.c.bf16 %v825_v55, %v825_v55  ;;  %v450_v55 = vlaneseq }
 0xd67   : > { %851 = vrot.lane.b32.xlu0 %v1766_v56, %s1583_s5  ;;  %v451_v58 = vshrl.u32 %v450_v55, 7 }
 0xdd9   : > { %v852_v57 = vpop.permute.xlu0 %851 }
 0xdda   : > { %1438 = vmatmul.mubr.msk.bf16.vlgmr.msra.gmra.mrb[8].mxu1 %vm365_vm2, %v852_v57  ;;  %v449_v57 = vunpack.c.0.s8 %v448_v54 }
 0xddb   : > { %1450 = vmatpush3.bf16.msra.mxu1 %v1647_v2  ;;  %1453 = vmatprep.mubr.msk.bf16.mxu1 %vm1580_vm1, %v1579_v0 }
 0xddc   : > { %1451 = vmatprep.subr.bf16.mxu1 %v1579_v0 }
 0xddf   : > { %1452 = vmatpush3.bf16.msra.mxu1 %v1650_v3 }
 0xead   : > { %v890_v60 = vpop.f32.mrb[8].mxu1 }
 0xeae   : > { %v896_v61 = vadd.f32 %v890_v60, %v850_v59  ;;  %v1439_v62 = vpop.f32.mrb[9].mxu1  ;;  %v452_v59 = vsub.s32 %v449_v57, %v451_v58 }
 0xeaf   : > { %v893_v63 = vpop.f32.mrb[10].mxu1 }
 0xeb0   : > { %1531 = vtanh.f32 %v896_v61  ;;  %v1440_v2 = vpop.f32.mrb[11].mxu1  ;;  %v1361_v4 = vmul.f32 -1.442695, %v896_v61  ;;  %v453_v62 = vrot.slane %v1687_v27, %v452_v59  ;;  %v739_v17 = vrot.slane %v1747_v33, %v452_v59 }
 0xeb1   : > { %v644_v2 = vrot.slane %v1727_v10, %v452_v59 }
 0xeb2   : > { %1533 = vpow2.f32 %v1361_v4  ;;  %v834_v4 = vrot.slane %v1766_v56, %v452_v59 }
 0xeba   : > { %v1532_v1 = vpop.eup %1531 }
 0xebb   : > { %906 = vrot.lane.b32.xlu1 %v1532_v1, %s1582_s30  ;;  %v460_v1 = vrot.slane %v453_v62, %v452_v59 }
 0xebc   : > { %v1534_v0 = vpop.eup %1533 }
 0xebd   : > { %v900_v3 = vadd.f32 1.0, %v1534_v0  ;;  %v651_v0 = vrot.slane %v644_v2, %v452_v59 }
 0xebf   : > { %1535 = vrcp.f32 %v900_v3 }
 0xec9   : > { %v1536_v5 = vpop.eup %1535 }
 0xeca   : > { %v904_v8 = vmul.f32 %v1536_v5, %v819_v52 }
 0xf2d   : > { %v907_v6 = vpop.permute.xlu1 %906 }
 0xf2e   : > { %v909_v7 = vmul.f32 %v1536_v5, %v907_v6  ;;  %v1585_v6 = vmov 1983009808  }
 0xf30   : > { %911 = vrot.lane.b32.xlu0 %v909_v7, %s1583_s5  ;;  %v1135_v7 = vunpack.c.l.s4 %v1585_v6 }
 0xfa2   : > { %v912_v9 = vpop.permute.xlu0 %911 }
 0xfa3   : > { %v914_v11 = vadd.f32 %v912_v9, %v904_v8  ;;  %v1136_v8 = vunpack.c.0.s8 %v1135_v7 }
 0xfa5   : > { %1537 = vtanh.f32 %v914_v11  ;;  %v1139_v10 = vsub.s32 %v1136_v8, %v451_v58 }
 0xfaf   : > { %v1538_v12 = vpop.eup %1537 }
 0xfb0   : > { %917 = vrot.lane.b32.xlu1 %v1538_v12, %s1582_s30 }
0x1022   : > { %v918_v13 = vpop.permute.xlu1 %917 }
0x1023   : > { %v920_v14 = vmul.f32 %v1536_v5, %v918_v13  ;;  %v841_v5 = vrot.slane %v834_v4, %v452_v59 }
0x1025   : > { %v1785_v15 = vpack.c.bf16 %v920_v14, %v920_v14  ;;  %v549_v14 = vrot.slane %v1707_v49, %v452_v59 }
0x1027   : > { %946 = vrot.lane.b32.xlu0 %v1785_v15, %s1583_s5 }
0x1099   : > { %v947_v16 = vpop.permute.xlu0 %946 }
0x109a   : > { %1446 = vmatmul.mubr.msk.bf16.vlgmr.msra.gmra.mrb[12].mxu0 %vm365_vm2, %v947_v16 }
0x116d   : > { %v985_v19 = vpop.f32.mrb[12].mxu0 }
0x116e   : > { %v991_v20 = vadd.f32 %v985_v19, %v945_v18  ;;  %v1447_v21 = vpop.f32.mrb[13].mxu0  ;;  %v556_v18 = vrot.slane %v549_v14, %v452_v59  ;;  %v929_v19 = vrot.slane %v1785_v15, %v452_v59 }
0x116f   : > { %v988_v22 = vpop.f32.mrb[14].mxu0 }
0x1170   : > { %1539 = vtanh.f32 %v991_v20  ;;  %v1448_v23 = vpop.f32.mrb[15].mxu0  ;;  %v1363_v25 = vmul.f32 -1.442695, %v991_v20  ;;  %v746_v20 = vrot.slane %v739_v17, %v452_v59  ;;  %v936_v21 = vrot.slane %v929_v19, %v452_v59 }
0x1172   : > { %1541 = vpow2.f32 %v1363_v25 }
0x117a   : > { %v1540_v24 = vpop.eup %1539 }
0x117b   : > { %1001 = vrot.lane.b32.xlu1 %v1540_v24, %s1582_s30 }
0x117c   : > { %v1542_v26 = vpop.eup %1541 }
0x117d   : > { %v995_v28 = vadd.f32 1.0, %v1542_v26 }
0x117f   : > { %1543 = vrcp.f32 %v995_v28 }
0x1189   : > { %v1544_v29 = vpop.eup %1543 }
0x118a   : > { %v999_v32 = vmul.f32 %v1544_v29, %v914_v11 }
0x11ed   : > { %v1002_v30 = vpop.permute.xlu1 %1001 }
0x11ee   : > { %v1004_v31 = vmul.f32 %v1544_v29, %v1002_v30 }
0x11f0   : > { %1006 = vrot.lane.b32.xlu0 %v1004_v31, %s1583_s5 }
0x1262   : > { %v1007_v34 = vpop.permute.xlu0 %1006 }
0x1263   : > { %v1009_v35 = vadd.f32 %v1007_v34, %v999_v32 }
0x1265   : > { %1545 = vtanh.f32 %v1009_v35 }
0x126f   : > { %v1546_v36 = vpop.eup %1545 }
0x1270   : > { %1012 = vrot.lane.b32.xlu1 %v1546_v36, %s1582_s30 }
0x12e2   : > { %v1013_v37 = vpop.permute.xlu1 %1012 }
0x12e3   : > { %v1015_v38 = vmul.f32 %v1544_v29, %v1013_v37 }
0x12e5   : > { %v1016_v39 = vpack.c.bf16 %v1015_v38, %v1015_v38 }
0x12e7   : > { %1041 = vrot.lane.b32.xlu0 %v1016_v39, %s1583_s5  ;;  %v1024_v3 = vrot.slane %v1016_v39, %v452_v59 }
0x12e9   : > { %v1031_v27 = vrot.slane %v1024_v3, %v452_v59 }
0x1359   : > { %v1042_v40 = vpop.permute.xlu0 %1041 }
0x135a   : > { %1454 = vmatmul.mubr.msk.bf16.vlgmr.msra.gmra.mrb[12].mxu1 %vm365_vm2, %v1042_v40 }
0x142d   : > { %v1080_v43 = vpop.f32.mrb[12].mxu1 }
0x142e   : > { %v1086_v44 = vadd.f32 %v1080_v43, %v1040_v42  ;;  %v1455_v45 = vpop.f32.mrb[13].mxu1 }
0x142f   : > { %v1083_v46 = vpop.f32.mrb[14].mxu1 }
0x1430   : > { %1547 = vtanh.f32 %v1086_v44  ;;  %v1456_v47 = vpop.f32.mrb[15].mxu1  ;;  %v1365_v50 = vmul.f32 -1.442695, %v1086_v44 }
0x1432   : > { %1549 = vpow2.f32 %v1365_v50 }
0x143a   : > { %v1548_v48 = vpop.eup %1547 }
0x143b   : > { %1096 = vrot.lane.b32.xlu1 %v1548_v48, %s1582_s30 }
0x143c   : > { %v1550_v51 = vpop.eup %1549 }
0x143d   : > { %v1090_v52 = vadd.f32 1.0, %v1550_v51 }
0x143f   : > { %1551 = vrcp.f32 %v1090_v52 }
0x1449   : > { %v1552_v60 = vpop.eup %1551 }
0x144a   : > { %v1094_v56 = vmul.f32 %v1552_v60, %v1009_v35 }
0x14ad   : > { %v1097_v61 = vpop.permute.xlu1 %1096 }
0x14ae   : > { %v1099_v63 = vmul.f32 %v1552_v60, %v1097_v61 }
0x14b0   : > { %1101 = vrot.lane.b32.xlu0 %v1099_v63, %s1583_s5 }
0x14b4   : > { %461 = vrot.lane.b32.xlu0 %v460_v1, %s1583_s5 }
0x14b8   : > { %652 = vrot.lane.b32.xlu0 %v651_v0, %s1583_s5 }
0x14bc   : > { %842 = vrot.lane.b32.xlu0 %v841_v5, %s1583_s5 }
0x14c0   : > { %1032 = vrot.lane.b32.xlu0 %v1031_v27, %s1583_s5 }
0x1522   : > { %v1102_v9 = vpop.permute.xlu0 %1101 }
0x1523   : > { %v1104_v11 = vadd.f32 %v1102_v9, %v1094_v56 }
0x1525   : > { %1553 = vtanh.f32 %v1104_v11  ;;  %v1140_v12 = vrot.slane %v1104_v11, %v1139_v10 }
0x1526   : > { %v462_v13 = vpop.permute.xlu0 %461 }
0x1527   : > { %466 = vst.msk [vmem:[%s464_s29] sm:$0x1] %vm338_vm0, %v462_v13  ;;  %1141 = vrot.lane.b32.xlu0 %v1140_v12, %s1586_s7 }
0x152a   : > { %v653_v49 = vpop.permute.xlu0 %652 }
0x152e   : > { %v843_v22 = vpop.permute.xlu0 %842 }
0x152f   : > { %v1554_v16 = vpop.eup %1553 }
0x1530   : > { %1107 = vrot.lane.b32.xlu1 %v1554_v16, %s1582_s30 }
0x1532   : > { %v1033_v33 = vpop.permute.xlu0 %1032 }
0x1534   : > { %557 = vrot.lane.b32.xlu1 %v556_v18, %s1583_s5 }
0x1538   : > { %747 = vrot.lane.b32.xlu1 %v746_v20, %s1583_s5 }
0x153c   : > { %937 = vrot.lane.b32.xlu1 %v936_v21, %s1583_s5 }
0x1599   : > { %v1142_v15 = vpop.permute.xlu0 %1141 }
0x159a   : > { %1145 = vst.msk [vmem:[#allocation3] sm:$0x3] %vm340_vm3, %v1142_v15  ;;  %1152 = vst.msk [vmem:[%s332_s9] sm:$0x3] %vm340_vm3, %v1142_v15 }
0x15a2   : > { %v1108_v23 = vpop.permute.xlu1 %1107 }
0x15a3   : > { %v1110_v24 = vmul.f32 %v1552_v60, %v1108_v23 }
0x15a5   : > { %v1111_v25 = vpack.c.bf16 %v1110_v24, %v1110_v24 }
0x15a6   : > { %v558_v26 = vpop.permute.xlu1 %557 }
0x15a7   : > { %v1119_v28 = vrot.slane %v1111_v25, %v452_v59  ;;  %561 = vst.msk [vmem:[%s560_s11] sm:$0x1] %vm338_vm0, %v558_v26  ;;  %v1146_v31 = vunpack.c.l.bf16 %v1111_v25 }
0x15a8   : > { %656 = vst.msk [vmem:[%s655_s13] sm:$0x1] %vm338_vm0, %v653_v49 }
0x15a9   : > { %v1126_v29 = vrot.slane %v1119_v28, %v452_v59 }
0x15aa   : > { %v748_v30 = vpop.permute.xlu1 %747 }
0x15ab   : > { %751 = vst.msk [vmem:[%s750_s20] sm:$0x1] %vm338_vm0, %v748_v30  ;;  %1127 = vrot.lane.b32.xlu1 %v1126_v29, %s1583_s5 }
0x15ac   : > { %846 = vst.msk [vmem:[%s845_s22] sm:$0x1] %vm338_vm0, %v843_v22 }
0x15ae   : > { %v938_v32 = vpop.permute.xlu1 %937 }
0x15af   : > { %941 = vst.msk [vmem:[%s940_s6] sm:$0x1] %vm338_vm0, %v938_v32  ;;  %1148 = vrot.lane.b32.xlu1 %v1146_v31, %s1583_s5 }
0x15b0   : > { %1036 = vst.msk [vmem:[%s1035_s8] sm:$0x1] %vm338_vm0, %v1033_v33 }
0x161d   : > { %v1128_v34 = vpop.permute.xlu1 %1127 }
0x161e   : > { %1131 = vst.msk [vmem:[%s1130_s10] sm:$0x1] %vm338_vm0, %v1128_v34  ;;  %1132 = vst.msk [vmem:[#allocation2] sm:$0x1] %vm338_vm0, %v1128_v34 }
0x1621   : > { %v1149_v35 = vpop.permute.xlu1 %1148 }
0x1622   : > { %1151 = vst.msk [vmem:[%s328_s26] sm:$0x3] %vm340_vm3, %v1149_v35 }
0x1623 PF: > { %s15_s17 = sadd.s32 1, %s1577_s17   ;;  %s1885_s15 = smov %s1573_s16 }
0x1624   : > { %p12_p6 = scmp.ge.s32.totalorder %s15_s17, 4   ;;  %s1886_s16 = smov %s1888_s18 }
0x1626   :  { %14 = sbr.rel (!%p12_p6) target bundleno = 2 (0x2), region = 105 }

</bundles_post_ra>
